<compile_context>
chip_gen: v7x
topology: tpu7x:2x2x1
jax: 0.10.0
libtpu: 0.0.40
codegen_flags: <defaults>
</compile_context>

<pallas_src>
import jax
import jax.numpy as jnp
from jax import lax
from jax.experimental import pallas as pl
from jax.experimental.pallas import tpu as pltpu

SMOOTH = 1.0
_LANES = 128
_SMALL_BYTES = 2 * 1024 * 1024   # total payload below this -> single-block kernel
_SPLIT_BYTES = 4 * 1024 * 1024   # per-array size above which we force >= 2 tiles
_UNROLL = 8                      # strip-loop unroll (modest, keeps code size sane)


def _round_up(x, m):
    return (x + m - 1) // m * m


def _vmem_capacity_bytes():
    """Generation-aware physical VMEM size; conservative fallback (v7x = 64 MiB)."""
    try:
        return int(pltpu.get_tpu_info().vmem_capacity_bytes)
    except Exception:
        return 64 * 1024 * 1024


# ----------------------------------------------------------------------------
# Small-input fast path: one full-array block, no grid, no pipelining.
# ----------------------------------------------------------------------------
def _make_small_kernel(n_preds):
    def kernel(*refs):
        pred_refs = refs[:n_preds]
        t = refs[n_preds][...].astype(jnp.float32)
        inter_refs = refs[n_preds + 1: 2 * n_preds + 1]
        sum_refs = refs[2 * n_preds + 1:]
        for k in range(n_preds):
            p = pred_refs[k][...].astype(jnp.float32)
            inter_refs[k][...] = jnp.sum(p * t, axis=1, keepdims=True)
            sum_refs[k][...] = jnp.sum(p + t, axis=1, keepdims=True)
    return kernel


# ----------------------------------------------------------------------------
# Tiled, HBM-bandwidth-bound path.
# ----------------------------------------------------------------------------
def _make_tiled_kernel(n_preds, rows, tile, tiles_per_chunk, n_total, unroll):
    n_strips = tile // _LANES

    def kernel(*refs):
        pred_refs = refs[:n_preds]
        t_ref = refs[n_preds]
        inter_refs = refs[n_preds + 1: 2 * n_preds + 1]
        sum_refs = refs[2 * n_preds + 1:]

        ci = pl.program_id(0)   # "parallel" chunk axis (v7x megacore)
        j = pl.program_id(1)    # "arbitrary" reduction axis

        @pl.when(j == 0)
        def _():
            for k in range(n_preds):
                inter_refs[k][...] = jnp.zeros_like(inter_refs[k])
                sum_refs[k][...] = jnp.zeros_like(sum_refs[k])

        # Valid columns of this step's tile: >= tile for interior tiles,
        # in (0, tile) for the tail tile, <= 0 for the padding step of an
        # uneven chunk split (then the accumulators are left untouched).
        valid = n_total - (ci * tiles_per_chunk + j) * tile

        def run(masked):
            def body(s, carry):
                off = pl.multiple_of(s * _LANES, _LANES)
                ts = t_ref[:, pl.ds(off, _LANES)].astype(jnp.float32)
                if masked:
                    col = lax.broadcasted_iota(jnp.int32, (rows, _LANES), 1) + off
                    keep = col < valid
                    ts = jnp.where(keep, ts, 0.0)
                out = []
                for k in range(n_preds):
                    ps = pred_refs[k][:, pl.ds(off, _LANES)].astype(jnp.float32)
                    if masked:
                        ps = jnp.where(keep, ps, 0.0)
                    out.append(carry[2 * k] + ps * ts)        # intersection
                    out.append(carry[2 * k + 1] + (ps + ts))  # fused denominator
                return tuple(out)

            init = []
            for k in range(n_preds):
                init.append(inter_refs[k][0])
                init.append(sum_refs[k][0])
            res = lax.fori_loop(0, n_strips, body, tuple(init), unroll=unroll)
            for k in range(n_preds):
                inter_refs[k][0] = res[2 * k]
                sum_refs[k][0] = res[2 * k + 1]

        @pl.when(valid >= tile)              # full tile: no masking overhead
        def _():
            run(masked=False)

        @pl.when(jnp.logical_and(valid > 0, valid < tile))   # masked tail tile
        def _():
            run(masked=True)

    return kernel


def _row_sums_multi(preds, t):
    """preds: list of (R, N); t: (R, N).  Returns (inters, denoms): lists of (R,) f32
    with inters[k] = sum_j p_k*t and denoms[k] = sum_j (p_k + t) per row."""
    n_preds = len(preds)
    rows, n = t.shape
    itemsizes = [int(p.dtype.itemsize) for p in preds]
    t_item = int(t.dtype.itemsize)
    total_bytes = rows * n * (sum(itemsizes) + t_item)

    # ---- small-input fast path --------------------------------------------
    if total_bytes <= _SMALL_BYTES:
        out_shape = [jax.ShapeDtypeStruct((rows, 1), jnp.float32)] * (2 * n_preds)
        full_spec = pl.BlockSpec((rows, n), lambda: (0, 0))
        out_spec = pl.BlockSpec((rows, 1), lambda: (0, 0))
        outs = pl.pallas_call(
            _make_small_kernel(n_preds),
            out_shape=out_shape,
            in_specs=[full_spec] * (n_preds + 1),
            out_specs=[out_spec] * (2 * n_preds),
        )(*preds, t)
        inters = [o.reshape(rows) for o in outs[:n_preds]]
        denoms = [o.reshape(rows) for o in outs[n_preds:]]
        return inters, denoms

    # ---- tiled path: size the lane tile by the chip's VMEM ------------------
    vmem_cap = _vmem_capacity_bytes()
    input_budget = (vmem_cap * 6) // 10                       # double-buffered inputs
    bytes_per_col = 2 * rows * (sum(itemsizes) + t_item)      # 2 pipeline buffers
    if bytes_per_col * _LANES > input_budget:
        # TODO(synk): block over rows (very large B*C); plain XLA reduction for now.
        t32 = t.astype(jnp.float32)
        inters, denoms = [], []
        for p in preds:
            p32 = p.astype(jnp.float32)
            inters.append(jnp.sum(p32 * t32, axis=1))
            denoms.append(jnp.sum(p32 + t32, axis=1))
        return inters, denoms

    n128 = _round_up(n, _LANES)
    tile = min((input_budget // bytes_per_col) // _LANES * _LANES, n128)
    # Prefer >= 2 reduction tiles on sizeable inputs so the leading "parallel"
    # chunk axis can shard across both TensorCores on v7x.
    max_item = max(itemsizes + [t_item])
    if tile >= n128 and rows * n * max_item >= _SPLIT_BYTES and n128 >= 2 * _LANES:
        tile = pl.cdiv(n128 // _LANES, 2) * _LANES

    num_tiles = pl.cdiv(n, tile)
    n_chunks = 2 if num_tiles >= 2 else 1
    tiles_per_chunk = pl.cdiv(num_tiles, n_chunks)
    unroll = max(1, min(_UNROLL, tile // _LANES))

    def in_map(ci, j):
        # Clamp so the (possibly) out-of-range padding step of an uneven chunk
        # split never issues an OOB DMA; that step's compute is skipped in-kernel.
        return (0, jnp.minimum(ci * tiles_per_chunk + j, num_tiles - 1))

    in_spec = pl.BlockSpec((rows, tile), in_map)
    acc_shape = jax.ShapeDtypeStruct((n_chunks, rows, _LANES), jnp.float32)
    acc_spec = pl.BlockSpec((1, rows, _LANES), lambda ci, j: (ci, 0, 0))

    kernel = _make_tiled_kernel(n_preds, rows, tile, tiles_per_chunk, n, unroll)
    outs = pl.pallas_call(
        kernel,
        out_shape=[acc_shape] * (2 * n_preds),
        grid_spec=pltpu.PrefetchScalarGridSpec(
            num_scalar_prefetch=0,
            grid=(n_chunks, tiles_per_chunk),
            in_specs=[in_spec] * (n_preds + 1),
            out_specs=[acc_spec] * (2 * n_preds),
        ),
        compiler_params=pltpu.CompilerParams(
            dimension_semantics=("parallel", "arbitrary"),
            vmem_limit_bytes=(vmem_cap * 9) // 10,
        ),
    )(*preds, t)

    # Tiny epilogue: fold chunks + lanes (a few KB) in f32.
    inters = [jnp.sum(o, axis=(0, 2)) for o in outs[:n_preds]]
    denoms = [jnp.sum(o, axis=(0, 2)) for o in outs[n_preds:]]
    return inters, denoms


def _dice_from_sums(inter, denom, b, c):
    # Rows are ordered (batch, channel): row = b * C + c.
    inter_c = inter.reshape(b, c).sum(axis=0)
    denom_c = denom.reshape(b, c).sum(axis=0)
    dsc = (2.0 * inter_c + SMOOTH) / (denom_c + SMOOTH)
    return 1.0 - jnp.mean(dsc)


def _dice_loss_impl(pred_list, y_true):
    b, c = y_true.shape[0], y_true.shape[1]
    n = 1
    for d in y_true.shape[2:]:
        n *= d
    # Free contiguous reshapes -- no transpose / extra HBM copy.
    t = y_true.reshape(b * c, n)
    preds = [p.reshape(b * c, n) for p in pred_list]
    inters, denoms = _row_sums_multi(preds, t)
    losses = [_dice_from_sums(i, s, b, c) for i, s in zip(inters, denoms)]
    return sum(losses) / len(losses)


@jax.jit
def dice_loss(y_preds, y_true):
    """Pallas equivalent of DiceLoss.forward (handles tuple or single tensor)."""
    if isinstance(y_preds, tuple):
        for y_p in y_preds:
            assert y_p.shape == y_true.shape
        # All predictions share y_true, so one fused kernel reads y_true once.
        return _dice_loss_impl(list(y_preds), y_true)
    assert y_preds.shape == y_true.shape
    return _dice_loss_impl([y_preds], y_true)


def _reference(y_pred, y_true):
    # Pure-JAX reference mirroring the PyTorch loop.
    c = y_pred.shape[1]
    dscs = []
    for i in range(c):
        p = y_pred[:, i].reshape(-1)
        t = y_true[:, i].reshape(-1)
        inter = jnp.sum(p * t)
        dscs.append((2.0 * inter + SMOOTH) / (jnp.sum(p) + jnp.sum(t) + SMOOTH))
    return 1.0 - jnp.mean(jnp.stack(dscs))


if __name__ == "__main__":
    key = jax.random.PRNGKey(0)
    k1, k2, k3, k4, k5 = jax.random.split(key, 5)

    # ---- small shapes (exercise the single-block fast-path kernel) ----------
    B, C, H, W = 2, 4, 16, 16
    y_pred = jax.nn.sigmoid(jax.random.normal(k1, (B, C, H, W), jnp.float32))
    y_true = (jax.random.uniform(k2, (B, C, H, W)) > 0.5).astype(jnp.float32)

    out = jax.block_until_ready(dice_loss(y_pred, y_true))
    ref = _reference(y_pred, y_true)
    assert jnp.allclose(out, ref, atol=1e-5, rtol=1e-5), (out, ref)

    # Tuple path: one fused kernel, y_true read once.
    y_pred2 = jax.nn.sigmoid(jax.random.normal(k3, (B, C, H, W), jnp.float32))
    out_t = jax.block_until_ready(dice_loss((y_pred, y_pred2), y_true))
    ref_t = (_reference(y_pred, y_true) + _reference(y_pred2, y_true)) / 2.0
    assert jnp.allclose(out_t, ref_t, atol=1e-5, rtol=1e-5), (out_t, ref_t)

    # ---- medium shape (exercises the tiled HBM-bound path: two "parallel"
    # chunks, one full tile and one in-kernel-masked tail tile) ---------------
    Bm, Cm, Hm, Wm = 2, 4, 400, 407
    y_pred_m = jax.nn.sigmoid(jax.random.normal(k4, (Bm, Cm, Hm, Wm), jnp.float32))
    y_true_m = (jax.random.uniform(k5, (Bm, Cm, Hm, Wm)) > 0.5).astype(jnp.float32)
    out_m = jax.block_until_ready(dice_loss(y_pred_m, y_true_m))
    ref_m = _reference(y_pred_m, y_true_m)
    assert jnp.allclose(out_m, ref_m, atol=1e-5, rtol=1e-4), (out_m, ref_m)

    print("KERNEL_OK")
</pallas_src>

<mosaic_0001>
module attributes {stable_mosaic.version = 11 : i64} {
  func.func @kernel(%arg0: memref<8x256xf32, #tpu.memory_space<vmem>>, %arg1: memref<8x256xf32, #tpu.memory_space<vmem>>, %arg2: memref<8x1xf32, #tpu.memory_space<vmem>>, %arg3: memref<8x1xf32, #tpu.memory_space<vmem>>) attributes {dimension_semantics = [], scalar_prefetch = 0 : i64, scratch_operands = 0 : i64, tpu.core_type = #tpu.core_type<tc>} {
    %c0 = arith.constant 0 : index
    %c0_0 = arith.constant 0 : index
    %0 = vector.load %arg1[%c0, %c0_0] : memref<8x256xf32, #tpu.memory_space<vmem>>, vector<8x256xf32>
    %c0_1 = arith.constant 0 : index
    %c0_2 = arith.constant 0 : index
    %1 = vector.load %arg0[%c0_1, %c0_2] : memref<8x256xf32, #tpu.memory_space<vmem>>, vector<8x256xf32>
    %2 = arith.mulf %1, %0 : vector<8x256xf32>
    %cst = arith.constant dense<0.000000e+00> : vector<8xf32>
    %3 = vector.multi_reduction <add>, %2, %cst [1] : vector<8x256xf32> to vector<8xf32>
    %4 = vector.shape_cast %3 : vector<8xf32> to vector<8x1xf32>
    %c0_3 = arith.constant 0 : index
    %c0_4 = arith.constant 0 : index
    %5 = vector.load %arg2[%c0_3, %c0_4] : memref<8x1xf32, #tpu.memory_space<vmem>>, vector<8x1xf32>
    tpu.vector_store %arg2[%c0_3, %c0_4], %4 {strides = array<i32>} : memref<8x1xf32, #tpu.memory_space<vmem>>, vector<8x1xf32>,
    %6 = arith.addf %1, %0 : vector<8x256xf32>
    %cst_5 = arith.constant dense<0.000000e+00> : vector<8xf32>
    %7 = vector.multi_reduction <add>, %6, %cst_5 [1] : vector<8x256xf32> to vector<8xf32>
    %8 = vector.shape_cast %7 : vector<8xf32> to vector<8x1xf32>
    %c0_6 = arith.constant 0 : index
    %c0_7 = arith.constant 0 : index
    %9 = vector.load %arg3[%c0_6, %c0_7] : memref<8x1xf32, #tpu.memory_space<vmem>>, vector<8x1xf32>
    tpu.vector_store %arg3[%c0_6, %c0_7], %8 {strides = array<i32>} : memref<8x1xf32, #tpu.memory_space<vmem>>, vector<8x1xf32>,
    return
  }
}

</mosaic_0001>

<bundles_post_ra>
// kernel: dice_loss.1
= control target key start
LH: loop header
LB: loop body
LE: loop exit
PB: predicated region body
PF: predicated region fallthrough
CT: control target
= control target key end

     0   :  { %vm22_vm0 = vcmask 7168   ;;  %s76_s0 = inlined_call_operand.vmem [shape: f32[8,256], index: 0, kind: input, shape index: {}]   ;;  %s77_s1 = inlined_call_operand.vmem [shape: f32[8,256], index: 1, kind: input, shape index: {}]   ;;  %s78_s2 = inlined_call_operand.vmem [shape: f32[8,1], index: 2, kind: output, shape index: {0}]   ;;  %s79_s3 = inlined_call_operand.vmem [shape: f32[8,1], index: 3, kind: output, shape index: {1}]  }
   0x1   :  { %v13_v0 = vld [vmem:[%s77_s1] sm:$0xff]  ;;  %v14_v1 = vld [vmem:[%s77_s1 + $0x8] sm:$0xff] }
   0x2   :  { %v15_v2 = vld [vmem:[%s76_s0] sm:$0xff]  ;;  %v16_v3 = vld [vmem:[%s76_s0 + $0x8] sm:$0xff] }
   0x3   :  { %v17_v4 = vmul.f32 %v15_v2, %v13_v0  ;;  %v18_v5 = vmul.f32 %v16_v3, %v14_v1  ;;  %v24_v6 = vadd.f32 %v15_v2, %v13_v0  ;;  %v25_v7 = vadd.f32 %v16_v3, %v14_v1 }
   0x5   :  { %v19_v8 = vadd.f32 %v18_v5, %v17_v4  ;;  %v26_v9 = vadd.f32 %v25_v7, %v24_v6 }
   0x7   :  { %20 = vadd.xlane.f32.xlu0 %v19_v8 }
   0xb   :  { %27 = vadd.xlane.f32.xlu0 %v26_v9 }
  0x94   :  { %v21_v10 = vpop.xlane.xlu0 %20 }
  0x95   :  { %23 = vst.msk [vmem:[%s78_s2] sm:$0xff] %vm22_vm0, %v21_v10 }
  0x98   :  { %v28_v11 = vpop.xlane.xlu0 %27 }
  0x99   :  { %29 = vst.msk [vmem:[%s79_s3] sm:$0xff] %vm22_vm0, %v28_v11 }

</bundles_post_ra>
